<compile_context>
chip_gen: v6e
topology: v6e:2x2x1
jax: 0.10.0
libtpu: 0.0.40
codegen_flags: <defaults>
</compile_context>

<pallas_src>
import functools

import numpy as np
import jax
import jax.numpy as jnp
from jax import lax
from jax.experimental import pallas as pl
from jax.experimental.pallas import tpu as pltpu


def _full_spec(shape):
    zeros = (0,) * len(shape)
    return pl.BlockSpec(shape, lambda i, _z=zeros: _z)


def _vmem_limit(nbytes):
    # explicit scoped-VMEM limit, scaled to actual need, capped to be safe on v7x
    return int(min(64 * 1024 * 1024, max(16 * 1024 * 1024, 2 * int(nbytes))))


# ---------------- Kernel 1: linear scorer + greedy heuristic + passthrough ----------
def _score_kernel(x_ref, w_ref, b_ref, adjT_ref, score_ref, upd_ref, xs_ref, ks_ref,
                  *, tm, num_rounds):
    r = pl.program_id(0)               # greedy round (outer, sequential)
    i = pl.program_id(1)               # node-row tile
    adjT = adjT_ref[...].astype(jnp.float32)     # (tm, Np), adjT[v, u] = #edges u->v
    off = pl.multiple_of(i * tm, tm)

    if num_rounds == 1:
        # k == 1: previous k_sums is all-ones -> the MXU mat-vec degenerates to a
        # lane-reduction row-sum (XLU); no scratch ping-pong needed.
        new_tile = 1.0 + jnp.sum(adjT, axis=1, keepdims=True)            # (tm, 1)
    else:
        is_first = r == 0
        prev_slot = (r + 1) % 2
        cur_slot = r % 2
        # k_sums of the previous round (ones on round 0); ping-pong buffers in scratch.
        prev_full = jnp.where(is_first, 1.0, ks_ref[prev_slot])                     # (Np,1)
        prev_tile = jnp.where(is_first, 1.0, ks_ref[prev_slot, pl.ds(off, tm), :])  # (tm,1)
        # greedy round as an MXU mat-vec:  k_sums[v] += sum_u adjT[v,u] * k_sums_prev[u]
        contrib = jnp.dot(adjT, prev_full, preferred_element_type=jnp.float32,
                          precision=lax.Precision.HIGHEST)
        new_tile = prev_tile + contrib
        ks_ref[cur_slot, pl.ds(off, tm), :] = new_tile

    def _emit_outputs():
        # scorer == 'linear': sigmoid(x @ W^T + b); passthrough == 'before', aggr_score=mul
        x = x_ref[...]                 # (tm, F) f32
        w = w_ref[...]                 # (1, F)  f32
        b = b_ref[0, 0]
        score = jax.nn.sigmoid(jnp.sum(x * w, axis=-1, keepdims=True) + b)
        score_ref[...] = score
        xs_ref[...] = x * score
        upd_ref[...] = score / new_tile

    if num_rounds == 1:
        _emit_outputs()
    else:
        # Only the last round's values are meaningful; earlier-round writebacks of these
        # blocks are overwritten by the final round (last HBM write per region).
        pl.when(r == num_rounds - 1)(_emit_outputs)


def score_heuristic(x_pad, w, b, adjT_bf, k):
    npad, f = x_pad.shape
    tm = 256 if npad % 256 == 0 else 128
    grid = (k, npad // tm)
    dim_sem = ("arbitrary", "parallel" if k == 1 else "arbitrary")
    vmem = _vmem_limit(2 * tm * npad * 2 + 4 * tm * f * 4 + 2 * npad * 4 + 8 * tm * 4)
    return pl.pallas_call(
        functools.partial(_score_kernel, tm=tm, num_rounds=k),
        grid=grid,
        in_specs=[
            pl.BlockSpec((tm, f), lambda r, i: (i, 0)),
            pl.BlockSpec((1, f), lambda r, i: (0, 0)),
            pl.BlockSpec((1, 1), lambda r, i: (0, 0)),
            pl.BlockSpec((tm, npad), lambda r, i: (i, 0)),
        ],
        out_specs=[
            pl.BlockSpec((tm, 1), lambda r, i: (i, 0)),
            pl.BlockSpec((tm, 1), lambda r, i: (i, 0)),
            pl.BlockSpec((tm, f), lambda r, i: (i, 0)),
        ],
        out_shape=[
            jax.ShapeDtypeStruct((npad, 1), jnp.float32),
            jax.ShapeDtypeStruct((npad, 1), jnp.float32),
            jax.ShapeDtypeStruct((npad, f), jnp.float32),
        ],
        scratch_shapes=[pltpu.VMEM((2, npad, 1), jnp.float32)],
        compiler_params=pltpu.CompilerParams(
            dimension_semantics=dim_sem, vmem_limit_bytes=vmem),
    )(x_pad, w, b, adjT_bf)


# ---------------- Kernel 2: maximal k-independent set + cluster rank ----------------
# TODO(synk): this kernel keeps the full (Np x Np) adjacency resident (the convergence
# loop is global over the graph); tiling/partitioning it is left for very large graphs.
def _mis_kernel(adjT_ref, a_ref, rank_row_ref, rank_col_ref, mis_ref, cr_ref, *, k):
    adjT = adjT_ref[...]               # (Np,Np) bf16 0/1, adjT[v,u] = edge u->v OR u==v
    adjT_b = adjT != 0
    a_b = a_ref[...] != 0              # (Np,Np) int8 -> bool, a[u,v] = edge u->v OR u==v
    rank_row = rank_row_ref[...]       # (1, Np) f32 (integer-valued; exact for Np < 2^24)
    rank_col = rank_col_ref[...]       # (Np, 1) f32
    npn = rank_row.shape[1]
    big = jnp.float32(npn)             # fill value "n" of the reference
    bf = adjT.dtype

    def min_chain(st, is_row):
        # k scatter_min steps over the *closed* in-neighborhood (self-loops folded in,
        # so the reference's extra elementwise minimum is unnecessary).  The state
        # orientation flips each step -> no eye-mask "transpose" is ever built.
        for _ in range(k):
            if is_row:
                st = jnp.min(jnp.where(adjT_b, st, big), axis=1, keepdims=True)  # (Np,1)
            else:
                st = jnp.min(jnp.where(a_b, st, big), axis=0, keepdims=True)     # (1,Np)
            is_row = not is_row
        return st

    k_odd = (k % 2) == 1
    rank_end = rank_row if k_odd else rank_col   # orientation after a col-start chain

    def or_step_col_from_col(m_col):
        # scatter_max of a 0/1 mask == "any masked in-neighbor (incl. self)" -> MXU matvec
        cnt = jnp.dot(adjT, m_col.astype(bf), preferred_element_type=jnp.float32)
        return (cnt > 0.5).astype(jnp.float32)

    def or_step_col_from_row(m_row):
        cnt = lax.dot_general(adjT, m_row.astype(bf), (((1,), (1,)), ((), ())),
                              preferred_element_type=jnp.float32)
        return (cnt > 0.5).astype(jnp.float32)

    def cond_fn(carry):
        it, _, mask_col = carry
        return jnp.logical_and(it < npn, jnp.any(mask_col < 0.5))

    def body_fn(carry):
        it, mis_e, mask_col = carry
        start = jnp.where(mask_col > 0.5, big, rank_col)        # min_rank reset
        mr = min_chain(start, is_row=False)                     # k-hop min of ranks
        mis_e = jnp.maximum(mis_e, (rank_end == mr).astype(jnp.float32))
        if k_odd:
            m = or_step_col_from_row(mis_e)
            rest = k - 1
        else:
            m = mis_e
            rest = k
        for _ in range(rest):
            m = or_step_col_from_col(m)
        return it + jnp.int32(1), mis_e, m

    mis0 = jnp.zeros_like(rank_end)
    mask0 = jnp.zeros_like(rank_col)
    # convergence-checked loop (reference: `while not mask.all()`); bounded by Np.
    _, mis_e, _ = lax.while_loop(cond_fn, body_fn, (jnp.int32(0), mis0, mask0))
    mis_ref[...] = mis_e

    # maximal_independent_set_cluster: propagate MIS ranks k hops (closed neighborhoods)
    start_c = jnp.where(mis_e > 0.5, rank_end, big)
    cr_ref[...] = min_chain(start_c, is_row=k_odd)              # always ends as (Np,1)


def mis_cluster(adjT_sl_bf, a_sl_i8, rank_row, rank_col, k):
    npad = adjT_sl_bf.shape[0]
    k_odd = (k % 2) == 1
    mis_shape = (1, npad) if k_odd else (npad, 1)
    vmem = _vmem_limit(11 * npad * npad)
    return pl.pallas_call(
        functools.partial(_mis_kernel, k=k),
        grid=(1,),
        in_specs=[_full_spec((npad, npad)), _full_spec((npad, npad)),
                  _full_spec((1, npad)), _full_spec((npad, 1))],
        out_specs=[_full_spec(mis_shape), _full_spec((npad, 1))],
        out_shape=[jax.ShapeDtypeStruct(mis_shape, jnp.float32),
                   jax.ShapeDtypeStruct((npad, 1), jnp.float32)],
        compiler_params=pltpu.CompilerParams(
            dimension_semantics=("arbitrary",), vmem_limit_bytes=vmem),
    )(adjT_sl_bf, a_sl_i8, rank_row, rank_col)


# ---------------- Kernel 3: tiled matmul (coarse-graph 'sum' coalesce) --------------
def _mm_kernel(a_ref, b_ref, o_ref, acc_ref, *, trans_a):
    @pl.when(pl.program_id(2) == 0)
    def _():
        acc_ref[...] = jnp.zeros_like(acc_ref)
    av = a_ref[...].astype(jnp.float32)
    bv = b_ref[...].astype(jnp.float32)
    dn = (((0,), (0,)), ((), ())) if trans_a else (((1,), (0,)), ((), ()))
    acc_ref[...] += lax.dot_general(av, bv, dn,
                                    preferred_element_type=jnp.float32,
                                    precision=lax.Precision.HIGHEST)
    @pl.when(pl.program_id(2) == pl.num_programs(2) - 1)
    def _():
        o_ref[...] = acc_ref[...]


def _matmul_tiled(a, b, *, trans_a=False):
    if trans_a:
        kdim, m = a.shape
    else:
        m, kdim = a.shape
    kdim2, n = b.shape
    assert kdim == kdim2
    tile = 256 if (m % 256 == 0 and n % 256 == 0 and kdim % 256 == 0) else 128
    tm = tn = tk = tile
    if trans_a:
        a_block, a_map = (tk, tm), (lambda i, j, kk: (kk, i))
    else:
        a_block, a_map = (tm, tk), (lambda i, j, kk: (i, kk))
    vmem = _vmem_limit(4 * (2 * tk * tm + 2 * tk * tn + 3 * tm * tn))
    return pl.pallas_call(
        functools.partial(_mm_kernel, trans_a=trans_a),
        grid=(m // tm, n // tn, kdim // tk),
        in_specs=[pl.BlockSpec(a_block, a_map),
                  pl.BlockSpec((tk, tn), lambda i, j, kk: (kk, j))],
        out_specs=pl.BlockSpec((tm, tn), lambda i, j, kk: (i, j)),
        out_shape=jax.ShapeDtypeStruct((m, n), jnp.float32),
        scratch_shapes=[pltpu.VMEM((tm, tn), jnp.float32)],
        compiler_params=pltpu.CompilerParams(
            dimension_semantics=("parallel", "parallel", "arbitrary"),
            vmem_limit_bytes=vmem),
    )(a, b)


# ---------------- forward (glue in plain JAX) ---------------------------------------
def kmis_pooling_forward(features, edge_index, edge_features, batch, w, b, k=1):
    assert k >= 1
    n, f = features.shape
    npad = ((n + 127) // 128) * 128
    row, col = edge_index[0], edge_index[1]
    e = row.shape[0]
    val = edge_features if edge_features is not None else jnp.ones((e,), jnp.float32)

    x_pad = jnp.zeros((npad, f), jnp.float32).at[:n, :].set(features)
    adj_cnt = jnp.zeros((npad, npad), jnp.float32).at[row, col].add(1.0)   # A[u, v]
    adj_val = jnp.zeros((npad, npad), jnp.float32).at[row, col].add(val)
    adjT_cnt_bf = adj_cnt.T.astype(jnp.bfloat16)

    # Kernel 1: score, greedy-updated score, x*score.
    score_p, upd_p, xs_p = score_heuristic(x_pad, w, b, adjT_cnt_bf, k)

    # perm = argsort(updated_score, descending); padded nodes forced to rank last.
    upd_vec = jnp.where(jnp.arange(npad) < n, upd_p[:, 0], -jnp.inf)
    perm = jnp.argsort(-upd_vec).astype(jnp.int32)
    rank = jnp.zeros((npad,), jnp.int32).at[perm].set(jnp.arange(npad, dtype=jnp.int32))
    rank_f = rank.astype(jnp.float32)

    # Kernel 2: MIS + cluster rank.  Self-loops folded into the 0/1 adjacency masks.
    eye_b = jnp.eye(npad, dtype=jnp.bool_)
    adjT_sl_bf = jnp.logical_or(adj_cnt.T > 0, eye_b).astype(jnp.bfloat16)
    a_sl_i8 = jnp.logical_or(adj_cnt > 0, eye_b).astype(jnp.int8)
    mis_o, cr_o = mis_cluster(adjT_sl_bf, a_sl_i8,
                              rank_f.reshape(1, npad), rank_f.reshape(npad, 1), k)
    mis_all = mis_o.reshape(npad) > 0.5
    clus_rank = cr_o.reshape(npad).astype(jnp.int32)

    # cluster[v] = node-order index among MIS nodes of the MIS node with rank clus_rank[v]
    # (equivalent to the reference's unique(return_inverse) + argsort(rank_mis) composition)
    mis_prefix = jnp.cumsum(mis_all.astype(jnp.int32)) - 1
    rank_to_cluster = jnp.zeros((npad,), jnp.int32).at[rank].set(
        jnp.where(mis_all, mis_prefix, 0))
    cluster_all = rank_to_cluster[clus_rank]
    c = jnp.sum(mis_all[:n].astype(jnp.int32))

    # Kernel 3: aggr_edge='sum' coalesce as S^T @ A_val @ S (bf16 one-hot S).
    s_onehot = jax.nn.one_hot(cluster_all, npad, dtype=jnp.bfloat16)       # (Np, Np)
    t = _matmul_tiled(s_onehot, adj_val, trans_a=True)                     # S^T @ A
    coarse_adj = _matmul_tiled(t, s_onehot, trans_a=False)                 # valid: [:c,:c]

    return (xs_p[:n], coarse_adj, mis_all[:n], cluster_all[:n], perm[:n],
            score_p[:n], upd_p[:n], c)


# ---------------- numpy mirror of the PyTorch reference (for verification) ----------
def _mis_reference_np(row, col, rank, k, n):
    rank = np.asarray(rank, dtype=np.int64)
    mis = np.zeros(n, dtype=bool)
    mask = mis.copy()
    min_rank = rank.copy()
    while not mask.all():
        for _ in range(k):
            min_neigh = np.full(n, n, dtype=np.int64)
            np.minimum.at(min_neigh, col, min_rank[row])
            min_rank = np.minimum(min_neigh, min_rank)
        mis = mis | (rank == min_rank)
        mask = mis.copy()
        for _ in range(k):
            mx = np.zeros(n, dtype=np.int64)
            np.maximum.at(mx, col, mask[row].astype(np.int64))
            mask = np.maximum(mx, mask.astype(np.int64)).astype(bool)
        min_rank = rank.copy()
        min_rank[mask] = n
    return mis


def _mis_cluster_reference_np(row, col, rank, k, n, mis):
    rank = np.asarray(rank, dtype=np.int64)
    min_rank = np.full(n, n, dtype=np.int64)
    min_rank[mis] = rank[mis]
    for _ in range(k):
        min_neigh = np.full(n, n, dtype=np.int64)
        np.minimum.at(min_neigh, col, min_rank[row])
        min_rank = np.minimum(min_neigh, min_rank)
    _, clusters = np.unique(min_rank, return_inverse=True)
    perm_sort = np.argsort(rank[mis], kind="stable")
    return perm_sort[clusters]


if __name__ == "__main__":
    key = jax.random.PRNGKey(0)
    N, F, E, K = 16, 32, 48, 1
    k1, k2, k3, k4 = jax.random.split(key, 4)

    features = jax.random.normal(k1, (N, F), dtype=jnp.float32)
    row = jax.random.randint(k2, (E,), 0, N, dtype=jnp.int32)
    col = jax.random.randint(k3, (E,), 0, N, dtype=jnp.int32)
    edge_index = jnp.stack([row, col])
    batch = jnp.zeros((N,), jnp.int32)

    # Linear(in_channels=F, out_features=1) params, deterministic init
    w = jax.random.normal(k4, (1, F), dtype=jnp.float32) / jnp.sqrt(jnp.float32(F))
    b = jnp.zeros((1, 1), jnp.float32)

    outs = kmis_pooling_forward(features, edge_index, None, batch, w, b, k=K)
    outs = jax.block_until_ready(outs)
    x_scored, coarse_adj, mis, cluster, perm, score, upd, c = outs

    # ---- verify against a numpy mirror of the reference module ----
    xf, rown, coln = np.asarray(features), np.asarray(row), np.asarray(col)
    wn, bn = np.asarray(w), float(np.asarray(b)[0, 0])

    score_ref = 1.0 / (1.0 + np.exp(-(xf @ wn.T + bn)))
    A = np.zeros((N, N), np.float64)
    np.add.at(A, (rown, coln), 1.0)
    k_sums = np.ones(N, np.float64)
    for _ in range(K):
        k_sums = k_sums + A.T @ k_sums
    upd_ref = score_ref[:, 0] / k_sums

    np.testing.assert_allclose(np.asarray(score)[:, 0], score_ref[:, 0], rtol=1e-4, atol=1e-5)
    np.testing.assert_allclose(np.asarray(upd)[:, 0], upd_ref, rtol=1e-4, atol=1e-5)
    np.testing.assert_allclose(np.asarray(x_scored), xf * score_ref, rtol=1e-4, atol=1e-5)

    rank_real = np.zeros(N, np.int64)
    rank_real[np.asarray(perm)] = np.arange(N)
    mis_ref = _mis_reference_np(rown, coln, rank_real, K, N)
    clus_ref = _mis_cluster_reference_np(rown, coln, rank_real, K, N, mis_ref)
    assert np.array_equal(np.asarray(mis), mis_ref)
    assert np.array_equal(np.asarray(cluster), clus_ref)

    c_np = int(np.asarray(c))
    assert c_np == int(mis_ref.sum())
    ca_ref = np.zeros((c_np, c_np), np.float64)
    np.add.at(ca_ref, (clus_ref[rown], clus_ref[coln]), 1.0)
    np.testing.assert_allclose(np.asarray(coarse_adj)[:c_np, :c_np], ca_ref,
                               rtol=1e-5, atol=1e-5)

    # ---- ragged (data-dependent-size) outputs: host-side selection ----
    # TODO(synk): dynamic-shape outputs (x[mis], nonzero edge extraction) cannot be
    # produced with static shapes inside a Pallas kernel; done on host instead.
    mis_np = np.asarray(mis)
    x_out = np.asarray(x_scored)[mis_np]                   # x = (features * score)[mis]
    ca = np.asarray(coarse_adj)[:c_np, :c_np]
    rr, cc = np.nonzero(ca)
    edge_index_out = np.stack([rr, cc]) if rr.size else np.zeros((2, 0), np.int64)
    edge_attr_out = ca[rr, cc]
    batch_out = np.asarray(batch)[mis_np]
    perm_out = np.asarray(perm)[mis_np]
    cluster_out = np.asarray(cluster)

    assert x_out.shape == (c_np, F)
    assert cluster_out.shape == (N,) and int(cluster_out.max()) < c_np
    print("KERNEL_OK")
</pallas_src>

<mosaic_0001>
module attributes {stable_mosaic.version = 11 : i64} {
  func.func @_score_kernel(%arg0: i32, %arg1: i32, %arg2: memref<128x32xf32, #tpu.memory_space<vmem>>, %arg3: memref<1x32xf32, #tpu.memory_space<vmem>>, %arg4: memref<1x1xf32, #tpu.memory_space<vmem>>, %arg5: memref<128x128xbf16, #tpu.memory_space<vmem>>, %arg6: memref<128x1xf32, #tpu.memory_space<vmem>>, %arg7: memref<128x1xf32, #tpu.memory_space<vmem>>, %arg8: memref<128x32xf32, #tpu.memory_space<vmem>>, %arg9: memref<2x128x1xf32, #tpu.memory_space<vmem>>) attributes {dimension_semantics = [#tpu.dimension_semantics<arbitrary>, #tpu.dimension_semantics<parallel>], iteration_bounds = array<i64: 1, 1>, scalar_prefetch = 0 : i64, scratch_operands = 1 : i64, tpu.core_type = #tpu.core_type<tc>, window_params = [{transform_indices = @transform_0, window_bounds = array<i64: 128, 32>}, {pipeline_mode = #tpu.pipeline_mode<synchronous>, transform_indices = @transform_1, window_bounds = array<i64: 1, 32>}, {pipeline_mode = #tpu.pipeline_mode<synchronous>, transform_indices = @transform_2, window_bounds = array<i64: 1, 1>}, {transform_indices = @transform_3, window_bounds = array<i64: 128, 128>}, {transform_indices = @transform_4, window_bounds = array<i64: 128, 1>}, {transform_indices = @transform_5, window_bounds = array<i64: 128, 1>}, {transform_indices = @transform_6, window_bounds = array<i64: 128, 32>}]} {
    %c0 = arith.constant 0 : index
    %c0_0 = arith.constant 0 : index
    %0 = vector.load %arg5[%c0, %c0_0] : memref<128x128xbf16, #tpu.memory_space<vmem>>, vector<128x128xbf16>
    %1 = arith.extf %0 : vector<128x128xbf16> to vector<128x128xf32>
    %cst = arith.constant dense<0.000000e+00> : vector<128xf32>
    %2 = vector.multi_reduction <add>, %1, %cst [1] : vector<128x128xf32> to vector<128xf32>
    %3 = vector.shape_cast %2 : vector<128xf32> to vector<128x1xf32>
    %cst_1 = arith.constant 1.000000e+00 : f32
    %4 = vector.broadcast %cst_1 : f32 to vector<128x1xf32>
    %5 = arith.addf %4, %3 : vector<128x1xf32>
    %c0_2 = arith.constant 0 : index
    %c0_3 = arith.constant 0 : index
    %6 = vector.load %arg2[%c0_2, %c0_3] : memref<128x32xf32, #tpu.memory_space<vmem>>, vector<128x32xf32>
    %c0_4 = arith.constant 0 : index
    %c0_5 = arith.constant 0 : index
    %7 = vector.load %arg3[%c0_4, %c0_5] : memref<1x32xf32, #tpu.memory_space<vmem>>, vector<1x32xf32>
    %c0_6 = arith.constant 0 : index
    %c0_7 = arith.constant 0 : index
    %8 = vector.load %arg4[%c0_6, %c0_7] : memref<1x1xf32, #tpu.memory_space<vmem>>, vector<1x1xf32>
    %9 = vector.extract %8[0, 0] : f32 from vector<1x1xf32>
    %10 = vector.broadcast %7 : vector<1x32xf32> to vector<128x32xf32>
    %11 = arith.mulf %6, %10 : vector<128x32xf32>
    %cst_8 = arith.constant dense<0.000000e+00> : vector<128xf32>
    %12 = vector.multi_reduction <add>, %11, %cst_8 [1] : vector<128x32xf32> to vector<128xf32>
    %13 = vector.shape_cast %12 : vector<128xf32> to vector<128x1xf32>
    %14 = vector.broadcast %9 : f32 to vector<128x1xf32>
    %15 = arith.addf %13, %14 : vector<128x1xf32>
    %16 = arith.negf %15 : vector<128x1xf32>
    %17 = math.exp %16 : vector<128x1xf32>
    %cst_9 = arith.constant 1.000000e+00 : f32
    %18 = vector.broadcast %cst_9 : f32 to vector<128x1xf32>
    %19 = arith.addf %18, %17 : vector<128x1xf32>
    %20 = arith.divf %18, %19 : vector<128x1xf32>
    %c0_10 = arith.constant 0 : index
    %c0_11 = arith.constant 0 : index
    %21 = vector.load %arg6[%c0_10, %c0_11] : memref<128x1xf32, #tpu.memory_space<vmem>>, vector<128x1xf32>
    tpu.vector_store %arg6[%c0_10, %c0_11], %20 {strides = array<i32>} : memref<128x1xf32, #tpu.memory_space<vmem>>, vector<128x1xf32>,
    %22 = vector.broadcast %20 : vector<128x1xf32> to vector<128x32xf32>
    %23 = arith.mulf %6, %22 : vector<128x32xf32>
    %c0_12 = arith.constant 0 : index
    %c0_13 = arith.constant 0 : index
    %24 = vector.load %arg8[%c0_12, %c0_13] : memref<128x32xf32, #tpu.memory_space<vmem>>, vector<128x32xf32>
    tpu.vector_store %arg8[%c0_12, %c0_13], %23 {strides = array<i32>} : memref<128x32xf32, #tpu.memory_space<vmem>>, vector<128x32xf32>,
    %25 = arith.divf %20, %5 : vector<128x1xf32>
    %c0_14 = arith.constant 0 : index
    %c0_15 = arith.constant 0 : index
    %26 = vector.load %arg7[%c0_14, %c0_15] : memref<128x1xf32, #tpu.memory_space<vmem>>, vector<128x1xf32>
    tpu.vector_store %arg7[%c0_14, %c0_15], %25 {strides = array<i32>} : memref<128x1xf32, #tpu.memory_space<vmem>>, vector<128x1xf32>,
    return
  }
  func.func @transform_0(%arg0: i32, %arg1: i32) -> (i32, i32) {
    %c0_i32 = arith.constant 0 : i32
    %c0_i32_0 = arith.constant 0 : i32
    return %arg1, %c0_i32 : i32, i32
  }
  func.func @transform_1(%arg0: i32, %arg1: i32) -> (i32, i32) {
    %c0_i32 = arith.constant 0 : i32
    %c0_i32_0 = arith.constant 0 : i32
    %c0_i32_1 = arith.constant 0 : i32
    return %c0_i32, %c0_i32_0 : i32, i32
  }
  func.func @transform_2(%arg0: i32, %arg1: i32) -> (i32, i32) {
    %c0_i32 = arith.constant 0 : i32
    %c0_i32_0 = arith.constant 0 : i32
    %c0_i32_1 = arith.constant 0 : i32
    return %c0_i32, %c0_i32_0 : i32, i32
  }
  func.func @transform_3(%arg0: i32, %arg1: i32) -> (i32, i32) {
    %c0_i32 = arith.constant 0 : i32
    %c0_i32_0 = arith.constant 0 : i32
    return %arg1, %c0_i32 : i32, i32
  }
  func.func @transform_4(%arg0: i32, %arg1: i32) -> (i32, i32) {
    %c0_i32 = arith.constant 0 : i32
    %c0_i32_0 = arith.constant 0 : i32
    return %arg1, %c0_i32 : i32, i32
  }
  func.func @transform_5(%arg0: i32, %arg1: i32) -> (i32, i32) {
    %c0_i32 = arith.constant 0 : i32
    %c0_i32_0 = arith.constant 0 : i32
    return %arg1, %c0_i32 : i32, i32
  }
  func.func @transform_6(%arg0: i32, %arg1: i32) -> (i32, i32) {
    %c0_i32 = arith.constant 0 : i32
    %c0_i32_0 = arith.constant 0 : i32
    return %arg1, %c0_i32 : i32, i32
  }
}

</mosaic_0001>

<bundles_post_ra>
// kernel: tpu_custom_call.1
= control target key start
LH: loop header
LB: loop body
LE: loop exit
PB: predicated region body
PF: predicated region fallthrough
CT: control target
= control target key end

     0   :  { %vm143_vm0 = vcmask 261120   ;;  %vm305_vm1 = vcmask 7168   ;;  %s1021_s0 = inlined_call_operand.vmem [shape: f32[128,32], index: 0, kind: input, shape index: {}]   ;;  %s1022_s1 = inlined_call_operand.vmem [shape: f32[1,32], index: 1, kind: input, shape index: {}]   ;;  %s1023_s2 = inlined_call_operand.<no memory space> [shape: f32[1,1], index: 2, kind: input, shape index: {}]   ;;  %s1024_s3 = inlined_call_operand.vmem [shape: bf16[128,128], index: 3, kind: input, shape index: {}]   ;;  %s1025_s4 = inlined_call_operand.vmem [shape: f32[128,1], index: 4, kind: output, shape index: {0}]   ;;  %s1026_s6 = inlined_call_operand.vmem [shape: f32[128,32], index: 6, kind: output, shape index: {2}]   ;;  %s1027_s5 = inlined_call_operand.vmem [shape: f32[128,1], index: 5, kind: output, shape index: {1}]  }
   0x1   :  { %v606_v0 = vld [vmem:[%s1021_s0 + $0x10] sm:$0xff]  ;;  %v414_v1 = vld [vmem:[%s1022_s1] ss:$0 sm:$0xff]  ;;  %v12_v3 = vstv %s1023_s2  ;;  %v624_v6 = vld [vmem:[%s1021_s0 + $0x18] sm:$0xff] }
   0x2   :  { %v614_v2 = vld [vmem:[%s1021_s0] sm:$0xff]  ;;  %v129_v4 = vmul.f32 %v414_v1, %v606_v0  ;;  %v629_v7 = vld [vmem:[%s1021_s0 + $0x8] sm:$0xff]  ;;  %13 = vst [vmem:[#allocation3] sm:$0x1] %v12_v3  ;;  %v130_v8 = vmul.f32 %v414_v1, %v624_v6  ;;  %v652_v18 = vld [vmem:[%s1021_s0 + $0x38] sm:$0xff] }
   0x3   :  { %v127_v5 = vmul.f32 %v414_v1, %v614_v2  ;;  %v128_v9 = vmul.f32 %v414_v1, %v629_v7  ;;  %v636_v10 = vld [vmem:[%s1021_s0 + $0x28] sm:$0xff]  ;;  %v641_v11 = vld [vmem:[%s1021_s0 + $0x20] sm:$0xff]  ;;  %v657_v19 = vld [vmem:[%s1021_s0 + $0x30] sm:$0xff]  ;;  %v134_v23 = vmul.f32 %v414_v1, %v652_v18 }
   0x4   :  { %v150_v12 = vsel %vm143_vm0, %v129_v4, 0.0  ;;  %v153_v14 = vsel %vm143_vm0, %v130_v8, 0.0  ;;  %v132_v16 = vmul.f32 %v414_v1, %v636_v10  ;;  %v131_v17 = vmul.f32 %v414_v1, %v641_v11  ;;  %v666_v25 = vld [vmem:[%s1021_s0 + $0x48] sm:$0xff]  ;;  %v671_v26 = vld [vmem:[%s1021_s0 + $0x40] sm:$0xff]  ;;  %v680_v31 = vld [vmem:[%s1021_s0 + $0x58] sm:$0xff] }
   0x5   :  { %v144_v13 = vsel %vm143_vm0, %v127_v5, 0.0  ;;  %151 = vadd.xlane.f32.xlu1 %v150_v12  ;;  %v147_v15 = vsel %vm143_vm0, %v128_v9, 0.0  ;;  %v133_v24 = vmul.f32 %v414_v1, %v657_v19  ;;  %v165_v27 = vsel %vm143_vm0, %v134_v23, 0.0  ;;  %v685_v32 = vld [vmem:[%s1021_s0 + $0x50] sm:$0xff]  ;;  %v694_v37 = vld [vmem:[%s1021_s0 + $0x68] sm:$0xff]  ;;  %v699_v38 = vld [vmem:[%s1021_s0 + $0x60] sm:$0xff] }
   0x6   :  { %145 = vadd.xlane.f32.xlu0 %v144_v13  ;;  %v159_v21 = vsel %vm143_vm0, %v132_v16, 0.0  ;;  %v156_v22 = vsel %vm143_vm0, %v131_v17, 0.0  ;;  %v136_v29 = vmul.f32 %v414_v1, %v666_v25  ;;  %v135_v30 = vmul.f32 %v414_v1, %v671_v26  ;;  %v708_v43 = vld [vmem:[%s1021_s0 + $0x78] sm:$0xff]  ;;  %v713_v44 = vld [vmem:[%s1021_s0 + $0x70] sm:$0xff]  ;;  %v432_v51 = vld [vmem:[%s1024_s3] sm:$0xff]  }
   0x7   :  { %v162_v28 = vsel %vm143_vm0, %v133_v24, 0.0  ;;  %v138_v35 = vmul.f32 %v414_v1, %v680_v31  ;;  %v137_v36 = vmul.f32 %v414_v1, %v685_v32  ;;  %v140_v41 = vmul.f32 %v414_v1, %v694_v37  ;;  %v463_v54 = vld [vmem:[%s1024_s3 + $0x8] sm:$0xff]   ;;  %v464_v57 = vld [vmem:[%s1024_s3 + $0x10] sm:$0xff]   ;;  %v465_v60 = vld [vmem:[%s1024_s3 + $0x18] sm:$0xff]  }
   0x8   :  { %v171_v33 = vsel %vm143_vm0, %v136_v29, 0.0  ;;  %v168_v34 = vsel %vm143_vm0, %v135_v30, 0.0  ;;  %v139_v42 = vmul.f32 %v414_v1, %v699_v38  ;;  %v142_v47 = vmul.f32 %v414_v1, %v708_v43  ;;  %v466_v63 = vld [vmem:[%s1024_s3 + $0x20] sm:$0xff]   ;;  %v467_v4 = vld [vmem:[%s1024_s3 + $0x28] sm:$0xff]   ;;  %v468_v9 = vld [vmem:[%s1024_s3 + $0x30] sm:$0xff]  }
   0x9   :  { %154 = vadd.xlane.f32.xlu1 %v153_v14  ;;  %v119_v20 = vld [vmem:[#allocation3] sm:$0x1]  ;;  %v177_v39 = vsel %vm143_vm0, %v138_v35, 0.0  ;;  %v174_v40 = vsel %vm143_vm0, %v137_v36, 0.0  ;;  %v183_v45 = vsel %vm143_vm0, %v140_v41, 0.0  ;;  %v141_v48 = vmul.f32 %v414_v1, %v713_v44  ;;  %v469_v14 = vld [vmem:[%s1024_s3 + $0x38] sm:$0xff]  }
   0xa   :  { %148 = vadd.xlane.f32.xlu0 %v147_v15  ;;  %470 = vpush %v119_v20  ;;  %v180_v46 = vsel %vm143_vm0, %v139_v42, 0.0  ;;  %v189_v49 = vsel %vm143_vm0, %v142_v47, 0.0  ;;  %v434_v52 = vunpack.c.h.bf16 %v432_v51  ;;  %v433_v53 = vunpack.c.l.bf16 %v432_v51 }
   0xb   :  { %v186_v50 = vsel %vm143_vm0, %v141_v48, 0.0  ;;  %v438_v55 = vunpack.c.h.bf16 %v463_v54  ;;  %v437_v56 = vunpack.c.l.bf16 %v463_v54  ;;  %v442_v58 = vunpack.c.h.bf16 %v464_v57 }
   0xc   :  { %v441_v59 = vunpack.c.l.bf16 %v464_v57  ;;  %v446_v61 = vunpack.c.h.bf16 %v465_v60  ;;  %v445_v62 = vunpack.c.l.bf16 %v465_v60  ;;  %v450_v1 = vunpack.c.h.bf16 %v466_v63 }
   0xd   :  { %160 = vadd.xlane.f32.xlu1 %v159_v21  ;;  %v449_v3 = vunpack.c.l.bf16 %v466_v63  ;;  %v454_v5 = vunpack.c.h.bf16 %v467_v4  ;;  %v453_v8 = vunpack.c.l.bf16 %v467_v4  ;;  %v458_v12 = vunpack.c.h.bf16 %v468_v9 }
   0xe   :  { %157 = vadd.xlane.f32.xlu0 %v156_v22  ;;  %v457_v13 = vunpack.c.l.bf16 %v468_v9  ;;  %v462_v15 = vunpack.c.h.bf16 %v469_v14  ;;  %v461_v16 = vunpack.c.l.bf16 %v469_v14 }
  0x11   :  { %166 = vadd.xlane.f32.xlu1 %v165_v27 }
  0x12   :  { %163 = vadd.xlane.f32.xlu0 %v162_v28 }
  0x15   :  { %172 = vadd.xlane.f32.xlu1 %v171_v33 }
  0x16   :  { %169 = vadd.xlane.f32.xlu0 %v168_v34 }
  0x19   :  { %178 = vadd.xlane.f32.xlu1 %v177_v39 }
  0x1a   :  { %175 = vadd.xlane.f32.xlu0 %v174_v40 }
  0x1d   :  { %184 = vadd.xlane.f32.xlu1 %v183_v45 }
  0x1e   :  { %181 = vadd.xlane.f32.xlu0 %v180_v46 }
  0x21   :  { %190 = vadd.xlane.f32.xlu1 %v189_v49 }
  0x22   :  { %187 = vadd.xlane.f32.xlu0 %v186_v50 }
  0x25   :  { %56 = vadd.xlane.f32.xlu1 %v434_v52 }
  0x26   :  { %54 = vadd.xlane.f32.xlu0 %v433_v53 }
  0x29   :  { %60 = vadd.xlane.f32.xlu1 %v438_v55 }
  0x2a   :  { %58 = vadd.xlane.f32.xlu0 %v437_v56 }
  0x2d   :  { %64 = vadd.xlane.f32.xlu1 %v442_v58 }
  0x2e   :  { %62 = vadd.xlane.f32.xlu0 %v441_v59 }
  0x31   :  { %68 = vadd.xlane.f32.xlu1 %v446_v61 }
  0x32   :  { %66 = vadd.xlane.f32.xlu0 %v445_v62 }
  0x35   :  { %72 = vadd.xlane.f32.xlu1 %v450_v1 }
  0x36   :  { %70 = vadd.xlane.f32.xlu0 %v449_v3 }
  0x39   :  { %76 = vadd.xlane.f32.xlu1 %v454_v5 }
  0x3a   :  { %74 = vadd.xlane.f32.xlu0 %v453_v8 }
  0x3b   :  { %s471_s20 = spop %470 }
  0x3c   :  { %v745_v17 = vstv %s471_s20 }
  0x3d   :  { %80 = vadd.xlane.f32.xlu1 %v458_v12 }
  0x3e   :  { %78 = vadd.xlane.f32.xlu0 %v457_v13 }
  0x41   :  { %84 = vadd.xlane.f32.xlu1 %v462_v15 }
  0x42   :  { %82 = vadd.xlane.f32.xlu0 %v461_v16 }
  0x8e   :  { %v152_v20 = vpop.xlane.xlu1 %151 }
  0x8f   :  { %v146_v21 = vpop.xlane.xlu0 %145  ;;  %v195_v22 = vadd.f32 %v745_v17, %v152_v20 }
  0x90   :  { %v193_v23 = vadd.f32 %v745_v17, %v146_v21 }
  0x91   :  { %v417_v24 = vmul.f32 -1.442695, %v195_v22 }
  0x92   :  { %v415_v27 = vmul.f32 -1.442695, %v193_v23  ;;  %v155_v28 = vpop.xlane.xlu1 %154 }
  0x93   :  { %v149_v29 = vpop.xlane.xlu0 %148  ;;  %472 = vpow2.f32 %v417_v24  ;;  %v196_v30 = vadd.f32 %v745_v17, %v155_v28 }
  0x94   :  { %v194_v33 = vadd.f32 %v745_v17, %v149_v29  ;;  %474 = vpow2.f32 %v415_v27 }
  0x95   :  { %v418_v34 = vmul.f32 -1.442695, %v196_v30 }
  0x96   :  { %v416_v35 = vmul.f32 -1.442695, %v194_v33  ;;  %v161_v36 = vpop.xlane.xlu1 %160 }
  0x97   :  { %v158_v39 = vpop.xlane.xlu0 %157  ;;  %476 = vpow2.f32 %v418_v34  ;;  %v198_v40 = vadd.f32 %v745_v17, %v161_v36 }
  0x98   :  { %v197_v41 = vadd.f32 %v745_v17, %v158_v39  ;;  %478 = vpow2.f32 %v416_v35 }
  0x99   :  { %v420_v42 = vmul.f32 -1.442695, %v198_v40 }
  0x9a   :  { %v419_v45 = vmul.f32 -1.442695, %v197_v41  ;;  %v167_v46 = vpop.xlane.xlu1 %166 }
  0x9b   :  { %v164_v47 = vpop.xlane.xlu0 %163  ;;  %480 = vpow2.f32 %v420_v42  ;;  %v200_v48 = vadd.f32 %v745_v17, %v167_v46 }
  0x9c   :  { %v199_v49 = vadd.f32 %v745_v17, %v164_v47  ;;  %482 = vpow2.f32 %v419_v45 }
  0x9d   :  { %v422_v50 = vmul.f32 -1.442695, %v200_v48 }
  0x9e   :  { %v421_v51 = vmul.f32 -1.442695, %v199_v49  ;;  %v173_v52 = vpop.xlane.xlu1 %172 }
  0x9f   :  { %v170_v53 = vpop.xlane.xlu0 %169  ;;  %484 = vpow2.f32 %v422_v50  ;;  %v202_v54 = vadd.f32 %v745_v17, %v173_v52 }
  0xa0   :  { %v201_v55 = vadd.f32 %v745_v17, %v170_v53  ;;  %v473_v56 = vpop.eup %472  ;;  %486 = vpow2.f32 %v421_v51 }
  0xa1   :  { %v475_v57 = vpop.eup %474  ;;  %v259_v58 = vadd.f32 1.0, %v473_v56  ;;  %v424_v59 = vmul.f32 -1.442695, %v202_v54 }
  0xa2   :  { %v257_v60 = vadd.f32 1.0, %v475_v57  ;;  %v423_v61 = vmul.f32 -1.442695, %v201_v55  ;;  %v179_v62 = vpop.xlane.xlu1 %178 }
  0xa3   :  { %v176_v63 = vpop.xlane.xlu0 %175  ;;  %488 = vrcp.f32 %v259_v58  ;;  %v204_v1 = vadd.f32 %v745_v17, %v179_v62 }
  0xa4   :  { %v203_v3 = vadd.f32 %v745_v17, %v176_v63  ;;  %v477_v4 = vpop.eup %476  ;;  %490 = vrcp.f32 %v257_v60 }
  0xa5   :  { %v479_v5 = vpop.eup %478  ;;  %v260_v8 = vadd.f32 1.0, %v477_v4  ;;  %492 = vpow2.f32 %v424_v59  ;;  %v426_v9 = vmul.f32 -1.442695, %v204_v1 }
  0xa6   :  { %v258_v12 = vadd.f32 1.0, %v479_v5  ;;  %494 = vpow2.f32 %v423_v61  ;;  %v425_v13 = vmul.f32 -1.442695, %v203_v3  ;;  %v185_v14 = vpop.xlane.xlu1 %184 }
  0xa7   :  { %v182_v15 = vpop.xlane.xlu0 %181  ;;  %496 = vrcp.f32 %v260_v8  ;;  %v206_v16 = vadd.f32 %v745_v17, %v185_v14 }
  0xa8   :  { %v205_v20 = vadd.f32 %v745_v17, %v182_v15  ;;  %v481_v21 = vpop.eup %480  ;;  %498 = vrcp.f32 %v258_v12 }
  0xa9   :  { %v483_v22 = vpop.eup %482  ;;  %v262_v23 = vadd.f32 1.0, %v481_v21  ;;  %500 = vpow2.f32 %v426_v9  ;;  %v428_v24 = vmul.f32 -1.442695, %v206_v16 }
  0xaa   :  { %v261_v27 = vadd.f32 1.0, %v483_v22  ;;  %502 = vpow2.f32 %v425_v13  ;;  %v427_v28 = vmul.f32 -1.442695, %v205_v20  ;;  %v191_v29 = vpop.xlane.xlu1 %190 }
  0xab   :  { %v188_v30 = vpop.xlane.xlu0 %187  ;;  %504 = vrcp.f32 %v262_v23  ;;  %v208_v33 = vadd.f32 %v745_v17, %v191_v29 }
  0xac   :  { %v207_v34 = vadd.f32 %v745_v17, %v188_v30  ;;  %v485_v35 = vpop.eup %484  ;;  %506 = vrcp.f32 %v261_v27 }
  0xad   :  { %v487_v36 = vpop.eup %486  ;;  %v264_v39 = vadd.f32 1.0, %v485_v35  ;;  %508 = vpow2.f32 %v428_v24  ;;  %v430_v40 = vmul.f32 -1.442695, %v208_v33 }
  0xae   :  { %v263_v41 = vadd.f32 1.0, %v487_v36  ;;  %510 = vpow2.f32 %v427_v28  ;;  %v429_v42 = vmul.f32 -1.442695, %v207_v34  ;;  %v57_v45 = vpop.xlane.xlu1 %56 }
  0xaf   :  { %v55_v46 = vpop.xlane.xlu0 %54  ;;  %512 = vrcp.f32 %v264_v39  ;;  %v87_v47 = vadd.f32 1.0, %v57_v45 }
  0xb0   :  { %v763_v48 = vpop.eup %488  ;;  %514 = vrcp.f32 %v263_v41  ;;  %v86_v49 = vadd.f32 1.0, %v55_v46 }
  0xb1   :  { %v765_v50 = vpop.eup %490  ;;  %308 = vst.msk [vmem:[%s1025_s4 + $0x10] sm:$0xff] %vm305_vm1, %v763_v48  ;;  %v324_v17 = vmul.f32 %v763_v48, %v606_v0  ;;  %516 = vpow2.f32 %v430_v40 }
  0xb2   :  { %v493_v51 = vpop.eup %492  ;;  %306 = vst.msk [vmem:[%s1025_s4] sm:$0xff] %vm305_vm1, %v765_v50  ;;  %v322_v52 = vmul.f32 %v765_v50, %v614_v2  ;;  %518 = vpow2.f32 %v429_v42  ;;  %v61_v53 = vpop.xlane.xlu1 %60 }
  0xb3   :  { %v59_v54 = vpop.xlane.xlu0 %58  ;;  %v495_v55 = vpop.eup %494  ;;  %340 = vst.msk [vmem:[%s1026_s6 + $0x10] sm:$0xff] %vm143_vm0, %v324_v17  ;;  %v266_v0 = vadd.f32 1.0, %v493_v51  ;;  %520 = vrcp.f32 %v87_v47  ;;  %v89_v56 = vadd.f32 1.0, %v61_v53 }
  0xb4   :  { %v785_v57 = vpop.eup %496  ;;  %338 = vst.msk [vmem:[%s1026_s6] sm:$0xff] %vm143_vm0, %v322_v52  ;;  %v265_v2 = vadd.f32 1.0, %v495_v55  ;;  %522 = vrcp.f32 %v86_v49  ;;  %v88_v58 = vadd.f32 1.0, %v59_v54 }
  0xb5   :  { %v791_v59 = vpop.eup %498  ;;  %309 = vst.msk [vmem:[%s1025_s4 + $0x18] sm:$0xff] %vm305_vm1, %v785_v57  ;;  %v325_v60 = vmul.f32 %v785_v57, %v624_v6  ;;  %524 = vrcp.f32 %v266_v0 }
  0xb6   :  { %v501_v61 = vpop.eup %500  ;;  %307 = vst.msk [vmem:[%s1025_s4 + $0x8] sm:$0xff] %vm305_vm1, %v791_v59  ;;  %v323_v62 = vmul.f32 %v791_v59, %v629_v7  ;;  %526 = vrcp.f32 %v265_v2  ;;  %v65_v63 = vpop.xlane.xlu1 %64 }
  0xb7   :  { %v63_v1 = vpop.xlane.xlu0 %62  ;;  %v503_v3 = vpop.eup %502  ;;  %341 = vst.msk [vmem:[%s1026_s6 + $0x18] sm:$0xff] %vm143_vm0, %v325_v60  ;;  %v268_v6 = vadd.f32 1.0, %v501_v61  ;;  %528 = vrcp.f32 %v89_v56  ;;  %v91_v4 = vadd.f32 1.0, %v65_v63 }
  0xb8   :  { %v811_v5 = vpop.eup %504  ;;  %339 = vst.msk [vmem:[%s1026_s6 + $0x8] sm:$0xff] %vm143_vm0, %v323_v62  ;;  %v267_v7 = vadd.f32 1.0, %v503_v3  ;;  %530 = vrcp.f32 %v88_v58  ;;  %v90_v8 = vadd.f32 1.0, %v63_v1 }
  0xb9   :  { %v817_v9 = vpop.eup %506  ;;  %311 = vst.msk [vmem:[%s1025_s4 + $0x28] sm:$0xff] %vm305_vm1, %v811_v5  ;;  %v327_v12 = vmul.f32 %v811_v5, %v636_v10  ;;  %532 = vrcp.f32 %v268_v6 }
  0xba   :  { %v509_v13 = vpop.eup %508  ;;  %310 = vst.msk [vmem:[%s1025_s4 + $0x20] sm:$0xff] %vm305_vm1, %v817_v9  ;;  %v326_v14 = vmul.f32 %v817_v9, %v641_v11  ;;  %534 = vrcp.f32 %v267_v7  ;;  %v69_v15 = vpop.xlane.xlu1 %68 }
  0xbb   :  { %v67_v16 = vpop.xlane.xlu0 %66  ;;  %v511_v20 = vpop.eup %510  ;;  %343 = vst.msk [vmem:[%s1026_s6 + $0x28] sm:$0xff] %vm143_vm0, %v327_v12  ;;  %v270_v10 = vadd.f32 1.0, %v509_v13  ;;  %536 = vrcp.f32 %v91_v4  ;;  %v93_v21 = vadd.f32 1.0, %v69_v15 }
  0xbc   :  { %v837_v22 = vpop.eup %512  ;;  %342 = vst.msk [vmem:[%s1026_s6 + $0x20] sm:$0xff] %vm143_vm0, %v326_v14  ;;  %v269_v11 = vadd.f32 1.0, %v511_v20  ;;  %538 = vrcp.f32 %v90_v8  ;;  %v92_v23 = vadd.f32 1.0, %v67_v16 }
  0xbd   :  { %v843_v24 = vpop.eup %514  ;;  %313 = vst.msk [vmem:[%s1025_s4 + $0x38] sm:$0xff] %vm305_vm1, %v837_v22  ;;  %v329_v27 = vmul.f32 %v837_v22, %v652_v18  ;;  %540 = vrcp.f32 %v270_v10 }
  0xbe   :  { %v517_v28 = vpop.eup %516  ;;  %312 = vst.msk [vmem:[%s1025_s4 + $0x30] sm:$0xff] %vm305_vm1, %v843_v24  ;;  %v328_v29 = vmul.f32 %v843_v24, %v657_v19  ;;  %542 = vrcp.f32 %v269_v11  ;;  %v73_v30 = vpop.xlane.xlu1 %72 }
  0xbf   :  { %v71_v33 = vpop.xlane.xlu0 %70  ;;  %v519_v34 = vpop.eup %518  ;;  %345 = vst.msk [vmem:[%s1026_s6 + $0x38] sm:$0xff] %vm143_vm0, %v329_v27  ;;  %v272_v18 = vadd.f32 1.0, %v517_v28  ;;  %544 = vrcp.f32 %v93_v21  ;;  %v95_v35 = vadd.f32 1.0, %v73_v30 }
  0xc0   :  { %v521_v36 = vpop.eup %520  ;;  %344 = vst.msk [vmem:[%s1026_s6 + $0x30] sm:$0xff] %vm143_vm0, %v328_v29  ;;  %v271_v39 = vadd.f32 1.0, %v519_v34  ;;  %546 = vrcp.f32 %v92_v23  ;;  %v94_v19 = vadd.f32 1.0, %v71_v33 }
  0xc1   :  { %v523_v40 = vpop.eup %522  ;;  %548 = vrcp.f32 %v272_v18  ;;  %v357_v41 = vmul.f32 %v521_v36, %v791_v59 }
  0xc2   :  { %v868_v42 = vpop.eup %524  ;;  %550 = vrcp.f32 %v271_v39  ;;  %v355_v45 = vmul.f32 %v523_v40, %v765_v50  ;;  %v77_v46 = vpop.xlane.xlu1 %76 }
  0xc3   :  { %v75_v47 = vpop.xlane.xlu0 %74  ;;  %v871_v49 = vpop.eup %526  ;;  %315 = vst.msk [vmem:[%s1025_s4 + $0x48] sm:$0xff] %vm305_vm1, %v868_v42  ;;  %v331_v17 = vmul.f32 %v868_v42, %v666_v25  ;;  %387 = vst.msk [vmem:[%s1027_s5 + $0x8] sm:$0xff] %vm305_vm1, %v357_v41  ;;  %552 = vrcp.f32 %v95_v35  ;;  %v97_v50 = vadd.f32 1.0, %v77_v46 }
  0xc4   :  { %v96_v51 = vadd.f32 1.0, %v75_v47  ;;  %v529_v52 = vpop.eup %528  ;;  %314 = vst.msk [vmem:[%s1025_s4 + $0x40] sm:$0xff] %vm305_vm1, %v871_v49  ;;  %v330_v53 = vmul.f32 %v871_v49, %v671_v26  ;;  %386 = vst.msk [vmem:[%s1027_s5] sm:$0xff] %vm305_vm1, %v355_v45  ;;  %554 = vrcp.f32 %v94_v19 }
  0xc5   :  { %v531_v25 = vpop.eup %530  ;;  %347 = vst.msk [vmem:[%s1026_s6 + $0x48] sm:$0xff] %vm143_vm0, %v331_v17  ;;  %v361_v54 = vmul.f32 %v529_v52, %v785_v57  ;;  %556 = vrcp.f32 %v97_v50 }
  0xc6   :  { %v533_v55 = vpop.eup %532  ;;  %346 = vst.msk [vmem:[%s1026_s6 + $0x40] sm:$0xff] %vm143_vm0, %v330_v53  ;;  %v359_v26 = vmul.f32 %v531_v25, %v763_v48  ;;  %558 = vrcp.f32 %v96_v51  ;;  %v81_v0 = vpop.xlane.xlu1 %80 }
  0xc7   :  { %v79_v56 = vpop.xlane.xlu0 %78  ;;  %v535_v2 = vpop.eup %534  ;;  %317 = vst.msk [vmem:[%s1025_s4 + $0x58] sm:$0xff] %vm305_vm1, %v533_v55  ;;  %v333_v57 = vmul.f32 %v533_v55, %v680_v31  ;;  %389 = vst.msk [vmem:[%s1027_s5 + $0x18] sm:$0xff] %vm305_vm1, %v361_v54  ;;  %v99_v58 = vadd.f32 1.0, %v81_v0 }
  0xc8   :  { %v98_v59 = vadd.f32 1.0, %v79_v56  ;;  %v537_v60 = vpop.eup %536  ;;  %316 = vst.msk [vmem:[%s1025_s4 + $0x50] sm:$0xff] %vm305_vm1, %v535_v2  ;;  %v332_v48 = vmul.f32 %v535_v2, %v685_v32  ;;  %388 = vst.msk [vmem:[%s1027_s5 + $0x10] sm:$0xff] %vm305_vm1, %v359_v26 }
  0xc9   :  { %v539_v31 = vpop.eup %538  ;;  %349 = vst.msk [vmem:[%s1026_s6 + $0x58] sm:$0xff] %vm143_vm0, %v333_v57  ;;  %v365_v61 = vmul.f32 %v537_v60, %v811_v5  ;;  %560 = vrcp.f32 %v99_v58 }
  0xca   :  { %v541_v62 = vpop.eup %540  ;;  %348 = vst.msk [vmem:[%s1026_s6 + $0x50] sm:$0xff] %vm143_vm0, %v332_v48  ;;  %v363_v32 = vmul.f32 %v539_v31, %v817_v9  ;;  %562 = vrcp.f32 %v98_v59  ;;  %v85_v63 = vpop.xlane.xlu1 %84 }
  0xcb   :  { %v83_v1 = vpop.xlane.xlu0 %82  ;;  %v543_v3 = vpop.eup %542  ;;  %319 = vst.msk [vmem:[%s1025_s4 + $0x68] sm:$0xff] %vm305_vm1, %v541_v62  ;;  %v335_v6 = vmul.f32 %v541_v62, %v694_v37  ;;  %391 = vst.msk [vmem:[%s1027_s5 + $0x28] sm:$0xff] %vm305_vm1, %v365_v61  ;;  %v101_v4 = vadd.f32 1.0, %v85_v63 }
  0xcc   :  { %v100_v5 = vadd.f32 1.0, %v83_v1  ;;  %v545_v7 = vpop.eup %544  ;;  %318 = vst.msk [vmem:[%s1025_s4 + $0x60] sm:$0xff] %vm305_vm1, %v543_v3  ;;  %v334_v8 = vmul.f32 %v543_v3, %v699_v38  ;;  %390 = vst.msk [vmem:[%s1027_s5 + $0x20] sm:$0xff] %vm305_vm1, %v363_v32 }
  0xcd   :  { %v547_v37 = vpop.eup %546  ;;  %351 = vst.msk [vmem:[%s1026_s6 + $0x68] sm:$0xff] %vm143_vm0, %v335_v6  ;;  %v369_v9 = vmul.f32 %v545_v7, %v837_v22  ;;  %564 = vrcp.f32 %v101_v4 }
  0xce   :  { %v549_v12 = vpop.eup %548  ;;  %350 = vst.msk [vmem:[%s1026_s6 + $0x60] sm:$0xff] %vm143_vm0, %v334_v8  ;;  %v367_v38 = vmul.f32 %v547_v37, %v843_v24  ;;  %566 = vrcp.f32 %v100_v5 }
  0xcf   :  { %v551_v13 = vpop.eup %550  ;;  %321 = vst.msk [vmem:[%s1025_s4 + $0x78] sm:$0xff] %vm305_vm1, %v549_v12  ;;  %v337_v14 = vmul.f32 %v549_v12, %v708_v43  ;;  %393 = vst.msk [vmem:[%s1027_s5 + $0x38] sm:$0xff] %vm305_vm1, %v369_v9 }
  0xd0   :  { %v553_v15 = vpop.eup %552  ;;  %320 = vst.msk [vmem:[%s1025_s4 + $0x70] sm:$0xff] %vm305_vm1, %v551_v13  ;;  %v336_v16 = vmul.f32 %v551_v13, %v713_v44  ;;  %392 = vst.msk [vmem:[%s1027_s5 + $0x30] sm:$0xff] %vm305_vm1, %v367_v38 }
  0xd1   :  { %v555_v20 = vpop.eup %554  ;;  %353 = vst.msk [vmem:[%s1026_s6 + $0x78] sm:$0xff] %vm143_vm0, %v337_v14  ;;  %v373_v43 = vmul.f32 %v553_v15, %v868_v42 }
  0xd2   :  { %v557_v10 = vpop.eup %556  ;;  %352 = vst.msk [vmem:[%s1026_s6 + $0x70] sm:$0xff] %vm143_vm0, %v336_v16  ;;  %v371_v44 = vmul.f32 %v555_v20, %v871_v49 }
  0xd3   :  { %v559_v21 = vpop.eup %558  ;;  %395 = vst.msk [vmem:[%s1027_s5 + $0x48] sm:$0xff] %vm305_vm1, %v373_v43  ;;  %v377_v22 = vmul.f32 %v557_v10, %v533_v55 }
  0xd4   :  { %394 = vst.msk [vmem:[%s1027_s5 + $0x40] sm:$0xff] %vm305_vm1, %v371_v44  ;;  %v375_v11 = vmul.f32 %v559_v21, %v535_v2 }
  0xd5   :  { %397 = vst.msk [vmem:[%s1027_s5 + $0x58] sm:$0xff] %vm305_vm1, %v377_v22 }
  0xd6   :  { %v561_v23 = vpop.eup %560  ;;  %396 = vst.msk [vmem:[%s1027_s5 + $0x50] sm:$0xff] %vm305_vm1, %v375_v11 }
  0xd7   :  { %v563_v24 = vpop.eup %562  ;;  %v381_v27 = vmul.f32 %v561_v23, %v541_v62 }
  0xd8   :  { %v379_v28 = vmul.f32 %v563_v24, %v543_v3 }
  0xd9   :  { %399 = vst.msk [vmem:[%s1027_s5 + $0x68] sm:$0xff] %vm305_vm1, %v381_v27 }
  0xda   :  { %v565_v29 = vpop.eup %564  ;;  %398 = vst.msk [vmem:[%s1027_s5 + $0x60] sm:$0xff] %vm305_vm1, %v379_v28 }
  0xdb   :  { %v567_v30 = vpop.eup %566  ;;  %v385_v33 = vmul.f32 %v565_v29, %v549_v12 }
  0xdc   :  { %v383_v34 = vmul.f32 %v567_v30, %v551_v13 }
  0xdd   :  { %401 = vst.msk [vmem:[%s1027_s5 + $0x78] sm:$0xff] %vm305_vm1, %v385_v33 }
  0xde   :  { %400 = vst.msk [vmem:[%s1027_s5 + $0x70] sm:$0xff] %vm305_vm1, %v383_v34 }

</bundles_post_ra>
